<compile_context>
chip_gen: v5e
topology: v5e:2x2
jax: 0.10.0
libtpu: 0.0.40
codegen_flags: <defaults>
</compile_context>

<pallas_src>
import functools

import jax
import jax.numpy as jnp
from jax.experimental import pallas as pl
from jax.experimental.pallas import tpu as pltpu


_NEG_INF = -1e30


def _round_up(x, m):
    return (x + m - 1) // m * m


def _vmem_limit_bytes():
    """Generation-aware scoped-VMEM limit: ~3/4 of physical VMEM, capped at 100 MiB."""
    try:
        cap = int(pltpu.get_tpu_info().vmem_capacity_bytes)
    except Exception:
        cap = 64 * 1024 * 1024          # conservative fallback, safe on every generation
    return min((cap * 3) // 4, 100 * 1024 * 1024)


# --------------------- pass 1a: per-(batch, channel) sum / sum-of-squares ---------------------

def _stats_kernel(x_ref, sum_ref, sq_ref):
    @pl.when(pl.program_id(1) == 0)
    def _():
        sum_ref[...] = jnp.zeros_like(sum_ref)
        sq_ref[...] = jnp.zeros_like(sq_ref)

    x = x_ref[0]                                              # (block_n, C_pad) f32
    sum_ref[0] += jnp.sum(x, axis=0, keepdims=True)           # padded rows are zero
    sq_ref[0] += jnp.sum(x * x, axis=0, keepdims=True)


# ------------------- pass 1b: GroupNorm apply + fused q/k/v 1x1 projections -------------------

def _norm_qkv_kernel(x_ref, sc_ref, sh_ref, w_ref, b_ref, q_ref, k_ref, v_ref, *, c_pad):
    hn = x_ref[0] * sc_ref[0] + sh_ref[0]                     # (block_n, C_pad) f32
    qkv = jnp.dot(hn.astype(jnp.bfloat16), w_ref[...],
                  preferred_element_type=jnp.float32) + b_ref[...]   # (block_n, 3*C_pad) f32
    q_ref[0] = qkv[:, :c_pad].astype(jnp.bfloat16)            # C^-0.5 already folded into w/b
    k_ref[0] = qkv[:, c_pad:2 * c_pad].astype(jnp.bfloat16)
    v_ref[0] = qkv[:, 2 * c_pad:].astype(jnp.bfloat16)


# -------- pass 2: flash attention + proj_out + residual (never builds the (N, N) matrix) --------

def _flash_attn_kernel(x_ref, q_ref, k_ref, v_ref, bias_ref, wp_ref, bp_ref, o_ref,
                       m_sc, l_sc, acc_sc, *, use_mask):
    ki = pl.program_id(2)

    @pl.when(ki == 0)
    def _():
        m_sc[...] = jnp.full_like(m_sc, _NEG_INF)
        l_sc[...] = jnp.zeros_like(l_sc)
        acc_sc[...] = jnp.zeros_like(acc_sc)

    # Contract the last dims of q and k -> (block_q, block_kv); no explicit k transpose (no XLU).
    s = jax.lax.dot_general(q_ref[0], k_ref[0], (((1,), (1,)), ((), ())),
                            preferred_element_type=jnp.float32)
    if use_mask:                               # static: only emitted when N has tile padding
        s = s + bias_ref[...]                  # (1, block_kv) additive padding mask, one VPU add

    m_prev = m_sc[...]
    m_new = jnp.maximum(m_prev, jnp.max(s, axis=-1, keepdims=True))
    alpha = jnp.exp(m_prev - m_new)
    p = jnp.exp(s - m_new)                                    # (block_q, block_kv) f32
    l_sc[...] = alpha * l_sc[...] + jnp.sum(p, axis=-1, keepdims=True)
    acc_sc[...] = alpha * acc_sc[...] + jnp.dot(p.astype(jnp.bfloat16), v_ref[0],
                                                preferred_element_type=jnp.float32)
    m_sc[...] = m_new

    @pl.when(ki == pl.num_programs(2) - 1)
    def _():
        inv_l = pl.reciprocal(l_sc[...], approx=True)         # EUP slot, once per q tile
        attn = (acc_sc[...] * inv_l).astype(jnp.bfloat16)     # (block_q, C_pad)
        h = jnp.dot(attn, wp_ref[...], preferred_element_type=jnp.float32) + bp_ref[...]
        o_ref[0] = x_ref[0] + h                               # residual in f32


# ----------------------------------------- wrapper -----------------------------------------

def _attn_block_impl(x_nchw, params, *, num_groups, eps, block_q, block_kv,
                     single_buffer_consts):
    B, C, H, W = x_nchw.shape
    N = H * W
    assert C % num_groups == 0, "GroupNorm requires channels divisible by num_groups"
    cg = C // num_groups
    scale = float(C) ** (-0.5)
    f32, bf16 = jnp.float32, jnp.bfloat16

    # ---- tiling ----
    C_pad = _round_up(C, 128)                    # lane-dense channels
    block_q = min(block_q, _round_up(N, 128))    # clamp to the (padded) sequence length
    block_kv = min(block_kv, block_q)            # never create fully-padded q tiles
    assert block_q % block_kv == 0, "block_q must be a multiple of block_kv"
    N_pad = _round_up(N, block_q)                # also a multiple of block_kv
    num_n = N_pad // block_q                     # pass-1 N tiles == pass-2 q tiles
    num_kv = N_pad // block_kv

    vmem_limit = _vmem_limit_bytes()
    cparams = lambda sem: pltpu.CompilerParams(
        dimension_semantics=sem, vmem_limit_bytes=vmem_limit)

    def const_spec(shape):
        # Constant-index operands (weights / biases): fetched once, single-buffered if supported.
        zeros = (0,) * len(shape)
        if single_buffer_consts:
            return pl.BlockSpec(shape, lambda *_: zeros, pipeline_mode=pl.Buffered(1))
        return pl.BlockSpec(shape, lambda *_: zeros)

    # ---- layout: NCHW -> (B, N_pad, C_pad), channels last (lane axis), zero padded ----
    # TODO(synk): transpose/pad here and slice/transpose at the end are XLA copies outside Pallas.
    x_bnc = jnp.transpose(x_nchw.reshape(B, C, N), (0, 2, 1)).astype(f32)
    x_p = jnp.pad(x_bnc, ((0, 0), (0, N_pad - N), (0, C_pad - C)))

    def pad_vec(v):                              # (C,) -> (1, C_pad) f32
        return jnp.pad(v.astype(f32), (0, C_pad - C)).reshape(1, C_pad)

    def pad_mat(w):                              # (C_in, C_out) -> (C_pad, C_pad) f32
        return jnp.pad(w.astype(f32), ((0, C_pad - C), (0, C_pad - C)))

    # Fused QKV weight / bias; the C^-0.5 attention scale is folded into the q columns.
    w_qkv = jnp.concatenate([pad_mat(params["wq"]) * scale,
                             pad_mat(params["wk"]),
                             pad_mat(params["wv"])], axis=1).astype(bf16)   # (C_pad, 3*C_pad)
    b_qkv = jnp.concatenate([pad_vec(params["bq"]) * scale,
                             pad_vec(params["bk"]),
                             pad_vec(params["bv"])], axis=1)                # (1, 3*C_pad) f32
    wp = pad_mat(params["wp"]).astype(bf16)
    bp = pad_vec(params["bp"])

    # -------------------- pass 1a: per-(batch, channel) sum / sum of squares --------------------
    stat_shape = jax.ShapeDtypeStruct((B, 1, C_pad), f32)
    ch_sum, ch_sq = pl.pallas_call(
        _stats_kernel,
        out_shape=[stat_shape, stat_shape],
        grid_spec=pltpu.PrefetchScalarGridSpec(
            num_scalar_prefetch=0,
            grid=(B, num_n),
            in_specs=[pl.BlockSpec((1, block_q, C_pad), lambda b, n: (b, n, 0))],
            out_specs=[pl.BlockSpec((1, 1, C_pad), lambda b, n: (b, 0, 0)),
                       pl.BlockSpec((1, 1, C_pad), lambda b, n: (b, 0, 0))],
        ),
        compiler_params=cparams(("parallel", "arbitrary")),
    )(x_p)

    # ---- tiny O(B*C) XLA math: group stats -> per-(batch, channel) affine (scale, shift) ----
    denom = float(N * cg)
    s1 = ch_sum[:, 0, :C].reshape(B, num_groups, cg)
    s2 = ch_sq[:, 0, :C].reshape(B, num_groups, cg)
    g_mean = s1.sum(axis=-1) / denom                                       # (B, G)
    g_rstd = jax.lax.rsqrt(s2.sum(axis=-1) / denom - g_mean * g_mean + eps)
    mean_c = jnp.repeat(g_mean, cg, axis=1)                                # (B, C)
    rstd_c = jnp.repeat(g_rstd, cg, axis=1)
    scale_c = rstd_c * params["gamma"].astype(f32)[None, :]
    shift_c = params["beta"].astype(f32)[None, :] - mean_c * scale_c
    scale_p = jnp.pad(scale_c, ((0, 0), (0, C_pad - C))).reshape(B, 1, C_pad)
    shift_p = jnp.pad(shift_c, ((0, 0), (0, C_pad - C))).reshape(B, 1, C_pad)

    # --------------------- pass 1b: GroupNorm apply + fused QKV projection ---------------------
    qkv_shape = jax.ShapeDtypeStruct((B, N_pad, C_pad), bf16)
    q, k, v = pl.pallas_call(
        functools.partial(_norm_qkv_kernel, c_pad=C_pad),
        out_shape=[qkv_shape, qkv_shape, qkv_shape],
        grid_spec=pltpu.PrefetchScalarGridSpec(
            num_scalar_prefetch=0,
            grid=(B, num_n),
            in_specs=[
                pl.BlockSpec((1, block_q, C_pad), lambda b, n: (b, n, 0)),   # x
                pl.BlockSpec((1, 1, C_pad), lambda b, n: (b, 0, 0)),         # scale (per batch)
                pl.BlockSpec((1, 1, C_pad), lambda b, n: (b, 0, 0)),         # shift (per batch)
                const_spec((C_pad, 3 * C_pad)),                              # fused QKV weight
                const_spec((1, 3 * C_pad)),                                  # fused QKV bias
            ],
            out_specs=[pl.BlockSpec((1, block_q, C_pad), lambda b, n: (b, n, 0))
                       for _ in range(3)],
        ),
        compiler_params=cparams(("parallel", "parallel")),
    )(x_p, scale_p, shift_p, w_qkv, b_qkv)

    # -------------------- pass 2: flash attention + proj_out + residual --------------------
    use_mask = N_pad > N
    kv_bias = jnp.where(jnp.arange(N_pad) < N, 0.0, _NEG_INF).astype(f32).reshape(1, N_pad)

    out_p = pl.pallas_call(
        functools.partial(_flash_attn_kernel, use_mask=use_mask),
        out_shape=jax.ShapeDtypeStruct((B, N_pad, C_pad), f32),
        grid_spec=pltpu.PrefetchScalarGridSpec(
            num_scalar_prefetch=0,
            grid=(B, num_n, num_kv),
            in_specs=[
                pl.BlockSpec((1, block_q, C_pad), lambda b, qi, ki: (b, qi, 0)),   # x (residual)
                pl.BlockSpec((1, block_q, C_pad), lambda b, qi, ki: (b, qi, 0)),   # q (pre-scaled)
                pl.BlockSpec((1, block_kv, C_pad), lambda b, qi, ki: (b, ki, 0)),  # k
                pl.BlockSpec((1, block_kv, C_pad), lambda b, qi, ki: (b, ki, 0)),  # v
                pl.BlockSpec((1, block_kv), lambda b, qi, ki: (0, ki)),            # kv padding bias
                const_spec((C_pad, C_pad)),                                        # wp
                const_spec((1, C_pad)),                                            # bp
            ],
            out_specs=pl.BlockSpec((1, block_q, C_pad), lambda b, qi, ki: (b, qi, 0)),
            scratch_shapes=[
                pltpu.VMEM((block_q, 1), f32),      # running max
                pltpu.VMEM((block_q, 1), f32),      # running sum
                pltpu.VMEM((block_q, C_pad), f32),  # output accumulator
            ],
        ),
        input_output_aliases={0: 0},                 # out = x + h : reuse x's HBM buffer
        compiler_params=cparams(("parallel", "parallel", "arbitrary")),
    )(x_p, q, k, v, kv_bias, wp, bp)

    out = out_p[:, :N, :C]
    return jnp.transpose(out, (0, 2, 1)).reshape(B, C, H, W)


def attn_block(x_nchw, params, *, num_groups=32, eps=1e-6, block_q=512, block_kv=512):
    """AttnBlock forward.  x_nchw: (B, C, H, W) float32 -> (B, C, H, W) float32.

    Tile-size guidance (block_q amortizes the per-q-tile K/V HBM stream; aim for >= 512):
      v5e : block_q 256-512, block_kv = block_q  (128 MiB VMEM; the small scoped default is
                                                  overridden via vmem_limit_bytes)
      v6e : block_q 512-1024, block_kv 512
      v7x : block_q 512,      block_kv 512       (64 MiB VMEM per core; limit set to ~48 MiB)
    block_kv is clamped to block_q (and block_q to the padded sequence length), so N_pad
    rounding never creates fully-padded q tiles.
    """
    kwargs = dict(num_groups=num_groups, eps=eps, block_q=block_q, block_kv=block_kv)
    try:
        return _attn_block_impl(x_nchw, params, single_buffer_consts=True, **kwargs)
    except Exception:
        # JAX build without per-operand pipeline_mode / Buffered(1) support: retry with default
        # double-buffered constant operands (slightly more VMEM, identical results).
        return _attn_block_impl(x_nchw, params, single_buffer_consts=False, **kwargs)


# ------------------------------------ reference & test ------------------------------------

def attn_block_reference(x, params, num_groups=32, eps=1e-6):
    B, C, H, W = x.shape
    cg = C // num_groups
    xg = x.reshape(B, num_groups, cg, H, W)
    mean = xg.mean(axis=(2, 3, 4), keepdims=True)
    var = xg.var(axis=(2, 3, 4), keepdims=True)
    hn = ((xg - mean) / jnp.sqrt(var + eps)).reshape(B, C, H, W)
    hn = hn * params["gamma"].reshape(1, C, 1, 1) + params["beta"].reshape(1, C, 1, 1)
    N = H * W
    hflat = hn.reshape(B, C, N)

    def conv(h, w_t, b):                 # w_t: (C_in, C_out)
        return jnp.einsum("bcn,cd->bdn", h, w_t) + b.reshape(1, C, 1)

    q = jnp.transpose(conv(hflat, params["wq"], params["bq"]), (0, 2, 1))   # (B, N, C)
    k = conv(hflat, params["wk"], params["bk"])                             # (B, C, N)
    v = conv(hflat, params["wv"], params["bv"])                             # (B, C, N)
    w_ = jnp.einsum("bnc,bcm->bnm", q, k) * (float(C) ** -0.5)
    w_ = jax.nn.softmax(w_, axis=2)
    h_ = jnp.einsum("bcm,bnm->bcn", v, w_)
    h_ = conv(h_, params["wp"], params["bp"]).reshape(B, C, H, W)
    return x + h_


def init_params(key, C):
    ks = jax.random.split(key, 10)

    def conv_wt(k):
        # PyTorch conv weight is (C_out, C_in, 1, 1); we store its transpose (C_in, C_out).
        return jax.random.normal(k, (C, C), jnp.float32) * 0.1

    return {
        "gamma": 1.0 + 0.05 * jax.random.normal(ks[0], (C,), jnp.float32),
        "beta": 0.05 * jax.random.normal(ks[1], (C,), jnp.float32),
        "wq": conv_wt(ks[2]), "bq": 0.05 * jax.random.normal(ks[3], (C,), jnp.float32),
        "wk": conv_wt(ks[4]), "bk": 0.05 * jax.random.normal(ks[5], (C,), jnp.float32),
        "wv": conv_wt(ks[6]), "bv": 0.05 * jax.random.normal(ks[7], (C,), jnp.float32),
        "wp": conv_wt(ks[8]), "bp": 0.05 * jax.random.normal(ks[9], (C,), jnp.float32),
    }


if __name__ == "__main__":
    key = jax.random.PRNGKey(0)
    k_x, k_p = jax.random.split(key)

    # C must be a multiple of 32 (default GroupNorm groups).  H = W = 12 -> N = 144 exercises the
    # padded-KV mask path; the explicit 128-tile run also exercises the multi-tile flash loop
    # (2 q tiles x 2 kv tiles with accumulator carry).
    B, C, H, W = 2, 32, 12, 12
    x = jax.random.normal(k_x, (B, C, H, W), jnp.float32)
    params = init_params(k_p, C)

    ref = attn_block_reference(x, params)

    out = attn_block(x, params)                                   # default (clamped) tiles
    jax.block_until_ready(out)
    assert out.shape == (B, C, H, W) and out.dtype == jnp.float32
    err = float(jnp.max(jnp.abs(out - ref)))
    assert err < 5e-2, f"max abs error too large (default tiles): {err}"

    out_tiled = attn_block(x, params, block_q=128, block_kv=128)  # multi-tile flash path
    jax.block_until_ready(out_tiled)
    err_tiled = float(jnp.max(jnp.abs(out_tiled - ref)))
    assert err_tiled < 5e-2, f"max abs error too large (128 tiles): {err_tiled}"

    print("KERNEL_OK")
</pallas_src>

<mosaic_0001>
module attributes {stable_mosaic.version = 11 : i64} {
  func.func @_stats_kernel(%arg0: i32, %arg1: i32, %arg2: memref<1x256x128xf32, #tpu.memory_space<vmem>>, %arg3: memref<1x1x128xf32, #tpu.memory_space<vmem>>, %arg4: memref<1x1x128xf32, #tpu.memory_space<vmem>>) attributes {dimension_semantics = [#tpu.dimension_semantics<parallel>, #tpu.dimension_semantics<arbitrary>], iteration_bounds = array<i64: 2, 1>, scalar_prefetch = 0 : i64, scratch_operands = 0 : i64, tpu.core_type = #tpu.core_type<tc>, window_params = [{transform_indices = @transform_0, window_bounds = array<i64: 1, 256, 128>}, {transform_indices = @transform_1, window_bounds = array<i64: 1, 1, 128>}, {transform_indices = @transform_2, window_bounds = array<i64: 1, 1, 128>}]} {
    %c0_i32 = arith.constant 0 : i32
    %0 = arith.cmpi eq, %arg1, %c0_i32 : i32
    %1 = arith.extui %0 : i1 to i32
    %c0_i32_0 = arith.constant 0 : i32
    %2 = arith.cmpi ne, %1, %c0_i32_0 : i32
    scf.if %2 {
      %cst_16 = arith.constant 0.000000e+00 : f32
      %22 = vector.broadcast %cst_16 : f32 to vector<1x1x128xf32>
      %c0_17 = arith.constant 0 : index
      %c0_18 = arith.constant 0 : index
      %c0_19 = arith.constant 0 : index
      %23 = vector.load %arg3[%c0_17, %c0_18, %c0_19] : memref<1x1x128xf32, #tpu.memory_space<vmem>>, vector<1x1x128xf32>
      tpu.vector_store %arg3[%c0_17, %c0_18, %c0_19], %22 {strides = array<i32>} : memref<1x1x128xf32, #tpu.memory_space<vmem>>, vector<1x1x128xf32>,
      %cst_20 = arith.constant 0.000000e+00 : f32
      %24 = vector.broadcast %cst_20 : f32 to vector<1x1x128xf32>
      %c0_21 = arith.constant 0 : index
      %c0_22 = arith.constant 0 : index
      %c0_23 = arith.constant 0 : index
      %25 = vector.load %arg4[%c0_21, %c0_22, %c0_23] : memref<1x1x128xf32, #tpu.memory_space<vmem>>, vector<1x1x128xf32>
      tpu.vector_store %arg4[%c0_21, %c0_22, %c0_23], %24 {strides = array<i32>} : memref<1x1x128xf32, #tpu.memory_space<vmem>>, vector<1x1x128xf32>,
    } else {
    }
    %c0 = arith.constant 0 : index
    %c0_1 = arith.constant 0 : index
    %c0_2 = arith.constant 0 : index
    %3 = vector.load %arg2[%c0, %c0_1, %c0_2] : memref<1x256x128xf32, #tpu.memory_space<vmem>>, vector<1x256x128xf32>
    %4 = vector.shape_cast %3 : vector<1x256x128xf32> to vector<256x128xf32>
    %c0_3 = arith.constant 0 : index
    %c0_4 = arith.constant 0 : index
    %c0_5 = arith.constant 0 : index
    %5 = vector.load %arg3[%c0_3, %c0_4, %c0_5] : memref<1x1x128xf32, #tpu.memory_space<vmem>>, vector<1x1x128xf32>
    %6 = vector.shape_cast %5 : vector<1x1x128xf32> to vector<1x128xf32>
    %cst = arith.constant dense<0.000000e+00> : vector<128xf32>
    %7 = vector.multi_reduction <add>, %4, %cst [0] : vector<256x128xf32> to vector<128xf32>
    %8 = vector.shape_cast %7 : vector<128xf32> to vector<1x128xf32>
    %9 = arith.addf %6, %8 : vector<1x128xf32>
    %c0_6 = arith.constant 0 : index
    %c0_7 = arith.constant 0 : index
    %c0_8 = arith.constant 0 : index
    %10 = vector.load %arg3[%c0_6, %c0_7, %c0_8] : memref<1x1x128xf32, #tpu.memory_space<vmem>>, vector<1x1x128xf32>
    %11 = vector.shape_cast %10 : vector<1x1x128xf32> to vector<1x128xf32>
    %12 = vector.shape_cast %9 : vector<1x128xf32> to vector<1x1x128xf32>
    tpu.vector_store %arg3[%c0_6, %c0_7, %c0_8], %12 {strides = array<i32>} : memref<1x1x128xf32, #tpu.memory_space<vmem>>, vector<1x1x128xf32>,
    %c0_9 = arith.constant 0 : index
    %c0_10 = arith.constant 0 : index
    %c0_11 = arith.constant 0 : index
    %13 = vector.load %arg4[%c0_9, %c0_10, %c0_11] : memref<1x1x128xf32, #tpu.memory_space<vmem>>, vector<1x1x128xf32>
    %14 = vector.shape_cast %13 : vector<1x1x128xf32> to vector<1x128xf32>
    %15 = arith.mulf %4, %4 : vector<256x128xf32>
    %cst_12 = arith.constant dense<0.000000e+00> : vector<128xf32>
    %16 = vector.multi_reduction <add>, %15, %cst_12 [0] : vector<256x128xf32> to vector<128xf32>
    %17 = vector.shape_cast %16 : vector<128xf32> to vector<1x128xf32>
    %18 = arith.addf %14, %17 : vector<1x128xf32>
    %c0_13 = arith.constant 0 : index
    %c0_14 = arith.constant 0 : index
    %c0_15 = arith.constant 0 : index
    %19 = vector.load %arg4[%c0_13, %c0_14, %c0_15] : memref<1x1x128xf32, #tpu.memory_space<vmem>>, vector<1x1x128xf32>
    %20 = vector.shape_cast %19 : vector<1x1x128xf32> to vector<1x128xf32>
    %21 = vector.shape_cast %18 : vector<1x128xf32> to vector<1x1x128xf32>
    tpu.vector_store %arg4[%c0_13, %c0_14, %c0_15], %21 {strides = array<i32>} : memref<1x1x128xf32, #tpu.memory_space<vmem>>, vector<1x1x128xf32>,
    return
  }
  func.func @transform_0(%arg0: i32, %arg1: i32) -> (i32, i32, i32) {
    %c0_i32 = arith.constant 0 : i32
    %c0_i32_0 = arith.constant 0 : i32
    return %arg0, %arg1, %c0_i32 : i32, i32, i32
  }
  func.func @transform_1(%arg0: i32, %arg1: i32) -> (i32, i32, i32) {
    %c0_i32 = arith.constant 0 : i32
    %c0_i32_0 = arith.constant 0 : i32
    %c0_i32_1 = arith.constant 0 : i32
    return %arg0, %c0_i32, %c0_i32_0 : i32, i32, i32
  }
  func.func @transform_2(%arg0: i32, %arg1: i32) -> (i32, i32, i32) {
    %c0_i32 = arith.constant 0 : i32
    %c0_i32_0 = arith.constant 0 : i32
    %c0_i32_1 = arith.constant 0 : i32
    return %arg0, %c0_i32, %c0_i32_0 : i32, i32, i32
  }
}

module attributes {stable_mosaic.version = 11 : i64} {
  func.func @_stats_kernel(%arg0: i32, %arg1: i32, %arg2: memref<1x256x128xf32, #tpu.memory_space<vmem>>, %arg3: memref<1x1x128xf32, #tpu.memory_space<vmem>>, %arg4: memref<1x1x128xf32, #tpu.memory_space<vmem>>) attributes {dimension_semantics = [#tpu.dimension_semantics<parallel>, #tpu.dimension_semantics<arbitrary>], iteration_bounds = array<i64: 2, 1>, scalar_prefetch = 0 : i64, scratch_operands = 0 : i64, tpu.core_type = #tpu.core_type<tc>, window_params = [{transform_indices = @transform_0, window_bounds = array<i64: 1, 256, 128>}, {transform_indices = @transform_1, window_bounds = array<i64: 1, 1, 128>}, {transform_indices = @transform_2, window_bounds = array<i64: 1, 1, 128>}]} {
    %c0_i32 = arith.constant 0 : i32
    %0 = arith.cmpi eq, %arg1, %c0_i32 : i32
    %1 = arith.extui %0 : i1 to i32
    %c0_i32_0 = arith.constant 0 : i32
    %2 = arith.cmpi ne, %1, %c0_i32_0 : i32
    scf.if %2 {
      %cst_16 = arith.constant 0.000000e+00 : f32
      %22 = vector.broadcast %cst_16 : f32 to vector<1x1x128xf32>
      %c0_17 = arith.constant 0 : index
      %c0_18 = arith.constant 0 : index
      %c0_19 = arith.constant 0 : index
      %23 = vector.load %arg3[%c0_17, %c0_18, %c0_19] : memref<1x1x128xf32, #tpu.memory_space<vmem>>, vector<1x1x128xf32>
      tpu.vector_store %arg3[%c0_17, %c0_18, %c0_19], %22 {strides = array<i32>} : memref<1x1x128xf32, #tpu.memory_space<vmem>>, vector<1x1x128xf32>,
      %cst_20 = arith.constant 0.000000e+00 : f32
      %24 = vector.broadcast %cst_20 : f32 to vector<1x1x128xf32>
      %c0_21 = arith.constant 0 : index
      %c0_22 = arith.constant 0 : index
      %c0_23 = arith.constant 0 : index
      %25 = vector.load %arg4[%c0_21, %c0_22, %c0_23] : memref<1x1x128xf32, #tpu.memory_space<vmem>>, vector<1x1x128xf32>
      tpu.vector_store %arg4[%c0_21, %c0_22, %c0_23], %24 {strides = array<i32>} : memref<1x1x128xf32, #tpu.memory_space<vmem>>, vector<1x1x128xf32>,
    } else {
    }
    %c0 = arith.constant 0 : index
    %c0_1 = arith.constant 0 : index
    %c0_2 = arith.constant 0 : index
    %3 = vector.load %arg2[%c0, %c0_1, %c0_2] : memref<1x256x128xf32, #tpu.memory_space<vmem>>, vector<1x256x128xf32>
    %4 = vector.shape_cast %3 : vector<1x256x128xf32> to vector<256x128xf32>
    %c0_3 = arith.constant 0 : index
    %c0_4 = arith.constant 0 : index
    %c0_5 = arith.constant 0 : index
    %5 = vector.load %arg3[%c0_3, %c0_4, %c0_5] : memref<1x1x128xf32, #tpu.memory_space<vmem>>, vector<1x1x128xf32>
    %6 = vector.shape_cast %5 : vector<1x1x128xf32> to vector<1x128xf32>
    %cst = arith.constant dense<0.000000e+00> : vector<128xf32>
    %7 = vector.multi_reduction <add>, %4, %cst [0] : vector<256x128xf32> to vector<128xf32>
    %8 = vector.shape_cast %7 : vector<128xf32> to vector<1x128xf32>
    %9 = arith.addf %6, %8 : vector<1x128xf32>
    %c0_6 = arith.constant 0 : index
    %c0_7 = arith.constant 0 : index
    %c0_8 = arith.constant 0 : index
    %10 = vector.load %arg3[%c0_6, %c0_7, %c0_8] : memref<1x1x128xf32, #tpu.memory_space<vmem>>, vector<1x1x128xf32>
    %11 = vector.shape_cast %10 : vector<1x1x128xf32> to vector<1x128xf32>
    %12 = vector.shape_cast %9 : vector<1x128xf32> to vector<1x1x128xf32>
    tpu.vector_store %arg3[%c0_6, %c0_7, %c0_8], %12 {strides = array<i32>} : memref<1x1x128xf32, #tpu.memory_space<vmem>>, vector<1x1x128xf32>,
    %c0_9 = arith.constant 0 : index
    %c0_10 = arith.constant 0 : index
    %c0_11 = arith.constant 0 : index
    %13 = vector.load %arg4[%c0_9, %c0_10, %c0_11] : memref<1x1x128xf32, #tpu.memory_space<vmem>>, vector<1x1x128xf32>
    %14 = vector.shape_cast %13 : vector<1x1x128xf32> to vector<1x128xf32>
    %15 = arith.mulf %4, %4 : vector<256x128xf32>
    %cst_12 = arith.constant dense<0.000000e+00> : vector<128xf32>
    %16 = vector.multi_reduction <add>, %15, %cst_12 [0] : vector<256x128xf32> to vector<128xf32>
    %17 = vector.shape_cast %16 : vector<128xf32> to vector<1x128xf32>
    %18 = arith.addf %14, %17 : vector<1x128xf32>
    %c0_13 = arith.constant 0 : index
    %c0_14 = arith.constant 0 : index
    %c0_15 = arith.constant 0 : index
    %19 = vector.load %arg4[%c0_13, %c0_14, %c0_15] : memref<1x1x128xf32, #tpu.memory_space<vmem>>, vector<1x1x128xf32>
    %20 = vector.shape_cast %19 : vector<1x1x128xf32> to vector<1x128xf32>
    %21 = vector.shape_cast %18 : vector<1x128xf32> to vector<1x1x128xf32>
    tpu.vector_store %arg4[%c0_13, %c0_14, %c0_15], %21 {strides = array<i32>} : memref<1x1x128xf32, #tpu.memory_space<vmem>>, vector<1x1x128xf32>,
    return
  }
  func.func @transform_0(%arg0: i32, %arg1: i32) -> (i32, i32, i32) {
    %c0_i32 = arith.constant 0 : i32
    %c0_i32_0 = arith.constant 0 : i32
    return %arg0, %arg1, %c0_i32 : i32, i32, i32
  }
  func.func @transform_1(%arg0: i32, %arg1: i32) -> (i32, i32, i32) {
    %c0_i32 = arith.constant 0 : i32
    %c0_i32_0 = arith.constant 0 : i32
    %c0_i32_1 = arith.constant 0 : i32
    return %arg0, %c0_i32, %c0_i32_0 : i32, i32, i32
  }
  func.func @transform_2(%arg0: i32, %arg1: i32) -> (i32, i32, i32) {
    %c0_i32 = arith.constant 0 : i32
    %c0_i32_0 = arith.constant 0 : i32
    %c0_i32_1 = arith.constant 0 : i32
    return %arg0, %c0_i32, %c0_i32_0 : i32, i32, i32
  }
}

</mosaic_0001>

<bundles_post_ra>
// kernel: tpu_custom_call.1
= control target key start
LH: loop header
LB: loop body
LE: loop exit
PB: predicated region body
PF: predicated region fallthrough
CT: control target
= control target key end

     0   :  { %8 = vsyncpa [#allocation3], 0  ;;  %s917_s0 = inlined_call_operand.hbm [shape: f32[2,256,128], index: 0, kind: input, shape index: {}]   ;;  %s918_s1 = inlined_call_operand.hbm [shape: f32[2,1,128], index: 1, kind: output, shape index: {0}]   ;;  %s919_s2 = inlined_call_operand.hbm [shape: f32[2,1,128], index: 2, kind: output, shape index: {1}]  }
   0x1   :  { %10 = vsyncpa [#allocation3 + $0x1], 0 }
   0x2   :  { %11 = vsyncpa [#allocation4], 0 }
   0x3   :  { %13 = vsyncpa [#allocation4 + $0x1], 0 }
   0x4   :  { %14 = vsyncpa [#allocation7], 0 }
   0x5   :  { %16 = vsyncpa [#allocation7 + $0x1], 0  ;;  %s721_s9 = smov 0   ;;  %s723_s10 = smov 0  }
   0x6   :  { %s725_s11 = smov 0   ;;  %s727_s12 = smov 0  }
   0x7   :  { %s729_s13 = smov 0   ;;  %s731_s14 = smov 0  }
   0x8 LB: > { %s475_s15 = sadd.s32 4294967295, %s701_s14   ;;  %s476_s16 = sadd.s32 4294967294, %s701_s14   ;;  %s701_s14 = sphi %s731_s14, %s22_s14   ;;  %s697_s13 = sphi %s729_s13, %s928_s13   ;;  %s693_s12 = sphi %s727_s12, %s927_s12   ;;  %s689_s11 = sphi %s725_s11, %s926_s11   ;;  %s685_s10 = sphi %s723_s10, %s925_s10   ;;  %s681_s9 = sphi %s721_s9, %s924_s9  }
   0x9   : > { %s34_s17 = sadd.s32 1, %s697_s13  ;;  %s43_s18 = sadd.s32 1, %s689_s11 }
   0xa   : > { %p36_p0 = scmp.ge.s32.totalorder %s34_s17, 2  ;;  %p50_p1 = scmp.ne.s32.totalorder %s689_s11, %s685_s10 }
   0xb   : > { %p51_p2 = scmp.eq.s32.totalorder %s701_s14, 0  ;;  %p56_p3 = scmp.ne.s32.totalorder %s685_s10, %s681_s9 }
   0xc   : > { %s930_s17 = smov (%p36_p0, %s34_s17), 0  ;;  %p57_p5 = scmp.eq.s32.totalorder %s475_s15, 0 }
   0xd   : > { %p762_p4 = por %p51_p2, %p50_p1  ;;  %s38_s20 = ssub.s32 %s697_s13, %s930_s17 }
   0xe   : > { %p80_p6 = scmp.eq.s32.totalorder %s475_s15, 1  ;;  %p41_p7 = scmp.eq.s32.totalorder %s38_s20, 0 }
   0xf   : > { %p768_p8 = por %p57_p5, %p56_p3  ;;  %p86_p10 = scmp.eq.s32.totalorder %s476_s16, 1 }
  0x10   : > { %p772_p9 = por %p80_p6, %p50_p1  ;;  %p478_p12 = scmp.ge.s32.totalorder %s701_s14, 2 }
  0x11   : > { %s777_s23 = scalar_select %p41_p7, %s689_s11, %s43_s18  }
  0x12   : > { %p779_p11 = por %p86_p10, %p56_p3  ;;  %p504_p13 = scmp.lt.s32.totalorder %s701_s14, 2 }
  0x13   : > { %s132_s25 = sand.u32 1, %s689_s11   ;;  %s486_s27 = sshll.u32 %s697_s13, 8 }
  0x14   : > { %s479_s26 = sshll.u32 %s132_s25, 8  ;;  %s143_s30 = scalar_lea.hbm %s917_s0, %s486_s27 }
  0x15   : > { %s136_s3 = scalar_lea.vmem [#allocation2], %s479_s26  ;;  %s144_s5 = sshll.u32 %s143_s30, 4  ;;  %s145_s5 = int_to_ptr.hbm [resolvable:$true] %s144_s5 }
  0x16   : > { %s146_s4 = sshll.u32 %s136_s3, 4  ;;  %p494_p0 = pnand %p504_p13, %p762_p4  ;;  %s147_s4 = int_to_ptr.vmem [resolvable:$true] %s146_s4 }
  0x17   : > { %p482_p1 = scmp.ge.s32.totalorder %s701_s14, 1  ;;  %s133_s6 = scalar_lea.sflag [#allocation3], %s132_s25 }
  0x18   : > { %s703_s7 = smov 128   ;;  %s704_s8 = smov 8  }
  0x19   : > { %496 = dma.hbm_to_vmem [thread:$0]  (!%p494_p0), %s145_s5, 4096, %s147_s4, %s133_s6, %s703_s7, %s703_s7, %s704_s8  }
  0x1a   : > { %p154_p2 = scmp.lt.s32.totalorder %s701_s14, 3 }
  0x1c   : > { %p155_p3 = pnand %p482_p1, %p154_p2 }
  0x1d   : > { %s795_s15 = sand.u32 (!%p155_p3), 1, %s685_s10  }
  0x1e   : > { %158 = sbr.rel (%p155_p3) target bundleno = 128 (0x80), region = 24  ;;  %s483_s16 = sshll.u32 (!%p155_p3), %s795_s15, 8 }
  0x1f   : > { %s161_s18 = scalar_lea.sflag (!%p155_p3), [#allocation3], %s795_s15  ;;  %s799_s20 = scalar_lea.vmem (!%p155_p3), [#allocation2], %s483_s16 }
  0x23   : > { %668 = dma.done.wait (%p768_p8), %s161_s18, 4096  }
  0x24   : > { %670 = vsyncadd (%p768_p8), %s161_s18, 4294963200  ;;  %s806_s19 = scalar_lea.vmem [#allocation5], %s795_s15  ;;  %v705_v0 = vmov 0.0   ;;  %s810_s25 = scalar_lea.vmem [#allocation6], %s795_s15  ;;  %v196_v1 = vld [vmem:[%s799_s20] sm:$0xff]  ;;  %v197_v2 = vld [vmem:[%s799_s20 + $0x8] sm:$0xff] }
  0x25   : > { %194 = vst [vmem:[%s806_s19] sm:$0x1] %v705_v0  ;;  %v198_v3 = vld [vmem:[%s799_s20 + $0x10] sm:$0xff]  ;;  %v199_v4 = vld [vmem:[%s799_s20 + $0x18] sm:$0xff]  ;;  %v229_v5 = vadd.f32 %v197_v2, %v196_v1  ;;  %v269_v6 = vmul.f32 %v196_v1, %v196_v1  ;;  %v270_v7 = vmul.f32 %v197_v2, %v197_v2  ;;  %v200_v9 = vld [vmem:[%s799_s20 + $0x20] sm:$0xff]  ;;  %s353_s27 = scalar_lea.hbm %s918_s1, %s693_s12  ;;  %s366_s30 = scalar_lea.hbm %s919_s2, %s693_s12 }
  0x26   : > { %195 = vst [vmem:[%s810_s25] sm:$0x1] %v705_v0  ;;  %v271_v8 = vmul.f32 %v198_v3, %v198_v3  ;;  %v272_v11 = vmul.f32 %v199_v4, %v199_v4  ;;  %v201_v13 = vld [vmem:[%s799_s20 + $0x28] sm:$0xff]  ;;  %v273_v15 = vmul.f32 %v200_v9, %v200_v9  ;;  %v202_v17 = vld [vmem:[%s799_s20 + $0x30] sm:$0xff]  ;;  %v203_v21 = vld [vmem:[%s799_s20 + $0x38] sm:$0xff]  ;;  %s355_s3 = sshll.u32 %s806_s19, 4  ;;  %s855_s4 = sshll.u32 %s353_s27, 4  ;;  %s356_s3 = int_to_ptr.vmem [resolvable:$true] %s355_s3  ;;  %s358_s4 = int_to_ptr.hbm [resolvable:$true] %s855_s4 }
  0x27   : > { %v230_v10 = vadd.f32 %v229_v5, %v198_v3  ;;  %v301_v12 = vadd.f32 %v270_v7, %v269_v6  ;;  %v274_v19 = vmul.f32 %v201_v13, %v201_v13  ;;  %v275_v23 = vmul.f32 %v202_v17, %v202_v17  ;;  %v204_v25 = vld [vmem:[%s799_s20 + $0x40] sm:$0xff]  ;;  %v205_v29 = vld [vmem:[%s799_s20 + $0x48] sm:$0xff]  ;;  %v206_v33 = vld [vmem:[%s799_s20 + $0x50] sm:$0xff]  ;;  %s368_s5 = sshll.u32 %s810_s25, 4  ;;  %s858_s6 = sshll.u32 %s366_s30, 4  ;;  %s863_s5 = int_to_ptr.vmem [resolvable:$true] %s368_s5  ;;  %s371_s6 = int_to_ptr.hbm [resolvable:$true] %s858_s6 }
  0x28   : > { %v276_v27 = vmul.f32 %v203_v21, %v203_v21  ;;  %v277_v31 = vmul.f32 %v204_v25, %v204_v25  ;;  %v278_v35 = vmul.f32 %v205_v29, %v205_v29  ;;  %v207_v37 = vld [vmem:[%s799_s20 + $0x58] sm:$0xff]  ;;  %v279_v39 = vmul.f32 %v206_v33, %v206_v33  ;;  %v208_v41 = vld [vmem:[%s799_s20 + $0x60] sm:$0xff]  ;;  %v209_v45 = vld [vmem:[%s799_s20 + $0x68] sm:$0xff]  ;;  %s341_s12 = scalar_lea.sflag [#allocation4], %s795_s15  ;;  %s601_s7 = sshra.s32 %s358_s4, 4  ;;  %s602_s7 = int_to_ptr.hbm [resolvable:$true] %s601_s7 }
  0x29   : > { %v231_v14 = vadd.f32 %v230_v10, %v199_v4  ;;  %v302_v16 = vadd.f32 %v301_v12, %v271_v8  ;;  %v280_v43 = vmul.f32 %v207_v37, %v207_v37  ;;  %v281_v47 = vmul.f32 %v208_v41, %v208_v41  ;;  %v210_v49 = vld [vmem:[%s799_s20 + $0x70] sm:$0xff]  ;;  %v211_v53 = vld [vmem:[%s799_s20 + $0x78] sm:$0xff]  ;;  %v212_v57 = vld [vmem:[%s799_s20 + $0x80] sm:$0xff]  ;;  %s603_s8 = scalar_lea.hbm %s602_s7, 1  ;;  %p608_p7 = scmp.lt.s32.totalorder %s602_s7, %s918_s1 }
  0x2a   : > { %v282_v51 = vmul.f32 %v209_v45, %v209_v45  ;;  %v283_v55 = vmul.f32 %v210_v49, %v210_v49  ;;  %v284_v59 = vmul.f32 %v211_v53, %v211_v53  ;;  %v213_v61 = vld [vmem:[%s799_s20 + $0x88] sm:$0xff]  ;;  %v285_v63 = vmul.f32 %v212_v57, %v212_v57  ;;  %v214_v1 = vld [vmem:[%s799_s20 + $0x90] sm:$0xff]  ;;  %v215_v5 = vld [vmem:[%s799_s20 + $0x98] sm:$0xff]  ;;  %p604_p4 = scmp.ne.s32.totalorder %s602_s7, %s603_s8 }
  0x2b   : > { %v232_v18 = vadd.f32 %v231_v14, %v200_v9  ;;  %v303_v20 = vadd.f32 %v302_v16, %v272_v11  ;;  %v286_v3 = vmul.f32 %v213_v61, %v213_v61  ;;  %v287_v7 = vmul.f32 %v214_v1, %v214_v1  ;;  %v216_v9 = vld [vmem:[%s799_s20 + $0xa0] sm:$0xff] }
  0x2c   : > { %v288_v11 = vmul.f32 %v215_v5, %v215_v5  ;;  %p605_p5 = pnand %p604_p4, %p772_p9 }
  0x2d   : > { %v233_v22 = vadd.f32 %v232_v18, %v201_v13  ;;  %v304_v24 = vadd.f32 %v303_v20, %v273_v15  ;;  %v217_v13 = vld [vmem:[%s799_s20 + $0xa8] sm:$0xff]  ;;  %v289_v15 = vmul.f32 %v216_v9, %v216_v9 }
  0x2e   : > { %p606_p6 = pneg %p605_p5 }
  0x2f   : > { %v234_v26 = vadd.f32 %v233_v22, %v202_v17  ;;  %v305_v28 = vadd.f32 %v304_v24, %v274_v19  ;;  %v218_v17 = vld [vmem:[%s799_s20 + $0xb0] sm:$0xff]  ;;  %v290_v19 = vmul.f32 %v217_v13, %v217_v13 }
  0x31   : > { %v235_v30 = vadd.f32 %v234_v26, %v203_v21  ;;  %v306_v32 = vadd.f32 %v305_v28, %v275_v23  ;;  %v219_v21 = vld [vmem:[%s799_s20 + $0xb8] sm:$0xff]  ;;  %v291_v23 = vmul.f32 %v218_v17, %v218_v17 }
  0x33   : > { %v236_v34 = vadd.f32 %v235_v30, %v204_v25  ;;  %v307_v36 = vadd.f32 %v306_v32, %v276_v27  ;;  %v220_v25 = vld [vmem:[%s799_s20 + $0xc0] sm:$0xff]  ;;  %v292_v27 = vmul.f32 %v219_v21, %v219_v21 }
  0x35   : > { %v237_v38 = vadd.f32 %v236_v34, %v205_v29  ;;  %v308_v40 = vadd.f32 %v307_v36, %v277_v31  ;;  %v221_v29 = vld [vmem:[%s799_s20 + $0xc8] sm:$0xff]  ;;  %v293_v31 = vmul.f32 %v220_v25, %v220_v25 }
  0x37   : > { %v238_v42 = vadd.f32 %v237_v38, %v206_v33  ;;  %v309_v44 = vadd.f32 %v308_v40, %v278_v35  ;;  %v222_v33 = vld [vmem:[%s799_s20 + $0xd0] sm:$0xff]  ;;  %v294_v35 = vmul.f32 %v221_v29, %v221_v29 }
  0x39   : > { %v239_v46 = vadd.f32 %v238_v42, %v207_v37  ;;  %v310_v48 = vadd.f32 %v309_v44, %v279_v39  ;;  %v223_v37 = vld [vmem:[%s799_s20 + $0xd8] sm:$0xff]  ;;  %v295_v39 = vmul.f32 %v222_v33, %v222_v33 }
  0x3b   : > { %v240_v50 = vadd.f32 %v239_v46, %v208_v41  ;;  %v311_v52 = vadd.f32 %v310_v48, %v280_v43  ;;  %v224_v41 = vld [vmem:[%s799_s20 + $0xe0] sm:$0xff]  ;;  %v296_v43 = vmul.f32 %v223_v37, %v223_v37 }
  0x3d   : > { %v241_v54 = vadd.f32 %v240_v50, %v209_v45  ;;  %v312_v56 = vadd.f32 %v311_v52, %v281_v47  ;;  %v225_v45 = vld [vmem:[%s799_s20 + $0xe8] sm:$0xff]  ;;  %v297_v47 = vmul.f32 %v224_v41, %v224_v41 }
  0x3f   : > { %v242_v58 = vadd.f32 %v241_v54, %v210_v49  ;;  %v313_v60 = vadd.f32 %v312_v56, %v282_v51  ;;  %v226_v49 = vld [vmem:[%s799_s20 + $0xf0] sm:$0xff]  ;;  %v298_v51 = vmul.f32 %v225_v45, %v225_v45 }
  0x41   : > { %v243_v62 = vadd.f32 %v242_v58, %v211_v53  ;;  %v314_v0 = vadd.f32 %v313_v60, %v283_v55  ;;  %v227_v53 = vld [vmem:[%s799_s20 + $0xf8] sm:$0xff]  ;;  %v299_v55 = vmul.f32 %v226_v49, %v226_v49  ;;  %s607_s20 = scalar_lea.hbm %s918_s1, 2 }
  0x42   : > { %v300_v58 = vmul.f32 %v227_v53, %v227_v53  ;;  %p609_p8 = scmp.lt.s32.totalorder %s607_s20, %s603_s8 }
  0x43   : > { %v244_v2 = vadd.f32 %v243_v62, %v212_v57  ;;  %v315_v4 = vadd.f32 %v314_v0, %v284_v59 }
  0x44   : > { %p610_p10 = por %p609_p8, %p608_p7 }
  0x45   : > { %v245_v6 = vadd.f32 %v244_v2, %v213_v61  ;;  %v316_v8 = vadd.f32 %v315_v4, %v285_v63 }
  0x46   : > { %p611_p13 = pnand %p610_p10, %p606_p6 }
  0x47   : > { %v246_v10 = vadd.f32 %v245_v6, %v214_v1  ;;  %v317_v12 = vadd.f32 %v316_v8, %v286_v3 }
  0x49   : > { %v247_v14 = vadd.f32 %v246_v10, %v215_v5  ;;  %v318_v16 = vadd.f32 %v317_v12, %v287_v7  ;;  %v228_v7 = vld [vmem:[%s806_s19] sm:$0x1] }
  0x4a   : > { %v268_v12 = vld [vmem:[%s810_s25] sm:$0x1] }
  0x4b   : > { %v248_v18 = vadd.f32 %v247_v14, %v216_v9  ;;  %v319_v20 = vadd.f32 %v318_v16, %v288_v11 }
  0x4d   : > { %v249_v22 = vadd.f32 %v248_v18, %v217_v13  ;;  %v320_v24 = vadd.f32 %v319_v20, %v289_v15 }
  0x4f   : > { %v250_v26 = vadd.f32 %v249_v22, %v218_v17  ;;  %v321_v28 = vadd.f32 %v320_v24, %v290_v19 }
  0x51   : > { %v251_v30 = vadd.f32 %v250_v26, %v219_v21  ;;  %v322_v32 = vadd.f32 %v321_v28, %v291_v23 }
  0x53   : > { %v252_v34 = vadd.f32 %v251_v30, %v220_v25  ;;  %v323_v36 = vadd.f32 %v322_v32, %v292_v27 }
  0x55   : > { %v253_v38 = vadd.f32 %v252_v34, %v221_v29  ;;  %v324_v40 = vadd.f32 %v323_v36, %v293_v31 }
  0x57   : > { %v254_v42 = vadd.f32 %v253_v38, %v222_v33  ;;  %v325_v44 = vadd.f32 %v324_v40, %v294_v35 }
  0x59   : > { %v255_v46 = vadd.f32 %v254_v42, %v223_v37  ;;  %v326_v48 = vadd.f32 %v325_v44, %v295_v39 }
  0x5b   : > { %v256_v50 = vadd.f32 %v255_v46, %v224_v41  ;;  %v327_v52 = vadd.f32 %v326_v48, %v296_v43 }
  0x5d   : > { %v257_v54 = vadd.f32 %v256_v50, %v225_v45  ;;  %v328_v56 = vadd.f32 %v327_v52, %v297_v47 }
  0x5f   : > { %v258_v57 = vadd.f32 %v257_v54, %v226_v49  ;;  %v329_v59 = vadd.f32 %v328_v56, %v298_v51 }
  0x61   : > { %v259_v60 = vadd.f32 %v258_v57, %v227_v53  ;;  %v330_v61 = vadd.f32 %v329_v59, %v299_v55 }
  0x63   : > { %v260_v62 = vrot.slane %v259_v60, 4  ;;  %v331_v63 = vadd.f32 %v330_v61, %v300_v58 }
  0x65   : > { %v261_v0 = vadd.f32 %v260_v62, %v259_v60  ;;  %v332_v1 = vrot.slane %v331_v63, 4 }
  0x67   : > { %v262_v2 = vrot.slane %v261_v0, 2  ;;  %v333_v3 = vadd.f32 %v332_v1, %v331_v63 }
  0x69   : > { %v263_v4 = vadd.f32 %v262_v2, %v261_v0  ;;  %v334_v5 = vrot.slane %v333_v3, 2 }
  0x6b   : > { %v264_v6 = vrot.slane %v263_v4, 1  ;;  %v335_v8 = vadd.f32 %v334_v5, %v333_v3 }
  0x6d   : > { %v265_v9 = vadd.f32 %v264_v6, %v263_v4  ;;  %v336_v10 = vrot.slane %v335_v8, 1 }
  0x6f   : > { %v266_v11 = vadd.f32 %v265_v9, %v228_v7  ;;  %v337_v13 = vadd.f32 %v336_v10, %v335_v8 }
  0x71   : > { %267 = vst [vmem:[%s806_s19] sm:$0x1] %v266_v11  ;;  %v338_v14 = vadd.f32 %v337_v13, %v268_v12 }
  0x72   : > { %614 = shalt.err (!%p611_p13)
}
  0x73   : > { %489 = dma.vmem_to_hbm [thread:$0]  (%p772_p9), %s356_s3, 16, %s358_s4, %s341_s12   ;;  %339 = vst [vmem:[%s810_s25] sm:$0x1] %v338_v14 }
  0x74   : > { %s345_s19 = scalar_lea.sflag [#allocation7], %s795_s15  ;;  %s629_s27 = sshra.s32 %s371_s6, 4  ;;  %s630_s27 = int_to_ptr.hbm [resolvable:$true] %s629_s27 }
  0x75   : > { %s631_s28 = scalar_lea.hbm %s630_s27, 1  ;;  %s635_s7 = scalar_lea.hbm %s919_s2, 2 }
  0x76   : > { %p632_p0 = scmp.ne.s32.totalorder %s630_s27, %s631_s28  ;;  %p636_p3 = scmp.lt.s32.totalorder %s630_s27, %s919_s2 }
  0x77   : > { %p637_p4 = scmp.lt.s32.totalorder %s635_s7, %s631_s28 }
  0x78   : > { %p633_p1 = pnand %p632_p0, %p772_p9 }
  0x79   : > { %p638_p5 = por %p637_p4, %p636_p3 }
  0x7a   : > { %p634_p2 = pneg %p633_p1 }
  0x7c   : > { %p639_p6 = pnand %p638_p5, %p634_p2 }
  0x7e   : > { %642 = shalt.err (!%p639_p6)
}
  0x7f   : > { %490 = dma.vmem_to_hbm [thread:$0]  (%p772_p9), %s863_s5, 16, %s371_s6, %s345_s19  }
  0x80 PF: > { %s382_s15 = sand.u32 1, %s681_s9   ;;  %p498_p7 = pnand %p478_p12, %p779_p11 }
  0x81   : > { %s383_s25 = scalar_lea.sflag [#allocation4], %s382_s15 }
  0x82   : > { %p499_p8 = pneg %p498_p7 }
  0x84   : > { %672 = dma.done.wait (%p499_p8), %s383_s25, 16  }
  0x85   : > { %674 = vsyncadd (%p499_p8), %s383_s25, 4294967280  ;;  %s392_s3 = scalar_lea.sflag [#allocation7], %s382_s15 }
  0x86   : > { %676 = dma.done.wait (%p499_p8), %s392_s3, 16  }
  0x87   : > { %678 = vsyncadd (%p499_p8), %s392_s3, 4294967280  ;;  %s22_s14 = sadd.s32 1, %s701_s14   ;;  %s924_s9 = smov %s685_s10 }
  0x88   : > { %p19_p10 = scmp.ge.s32.totalorder %s22_s14, 4   ;;  %s925_s10 = smov %s689_s11 }
  0x89   : > { %s926_s11 = smov %s777_s23  ;;  %s927_s12 = smov %s697_s13 }
  0x8a   : > { %s928_s13 = smov %s930_s17  ;;  %21 = sbr.rel (!%p19_p10) target bundleno = 8 (0x8), region = 90 }
  0x8f   :  { %397 = vsyncpa [#allocation3], 1 }
  0x90   :  { %399 = vsyncpa [#allocation3 + $0x1], 1 }
  0x91   :  { %400 = vsyncpa [#allocation4], 1 }
  0x92   :  { %402 = vsyncpa [#allocation4 + $0x1], 1 }
  0x93   :  { %403 = vsyncpa [#allocation7], 1 }
  0x94   :  { %405 = vsyncpa [#allocation7 + $0x1], 1 }

// kernel: tpu_custom_call.1
= control target key start
LH: loop header
LB: loop body
LE: loop exit
PB: predicated region body
PF: predicated region fallthrough
CT: control target
= control target key end

     0   :  { %8 = vsyncpa [#allocation3], 0  ;;  %s917_s0 = inlined_call_operand.hbm [shape: f32[2,256,128], index: 0, kind: input, shape index: {}]   ;;  %s918_s1 = inlined_call_operand.hbm [shape: f32[2,1,128], index: 1, kind: output, shape index: {0}]   ;;  %s919_s2 = inlined_call_operand.hbm [shape: f32[2,1,128], index: 2, kind: output, shape index: {1}]  }
   0x1   :  { %10 = vsyncpa [#allocation3 + $0x1], 0 }
   0x2   :  { %11 = vsyncpa [#allocation4], 0 }
   0x3   :  { %13 = vsyncpa [#allocation4 + $0x1], 0 }
   0x4   :  { %14 = vsyncpa [#allocation7], 0 }
   0x5   :  { %16 = vsyncpa [#allocation7 + $0x1], 0  ;;  %s721_s9 = smov 0   ;;  %s723_s10 = smov 0  }
   0x6   :  { %s725_s11 = smov 0   ;;  %s727_s12 = smov 0  }
   0x7   :  { %s729_s13 = smov 0   ;;  %s731_s14 = smov 0  }
   0x8 LB: > { %s475_s15 = sadd.s32 4294967295, %s701_s14   ;;  %s476_s16 = sadd.s32 4294967294, %s701_s14   ;;  %s701_s14 = sphi %s731_s14, %s22_s14   ;;  %s697_s13 = sphi %s729_s13, %s928_s13   ;;  %s693_s12 = sphi %s727_s12, %s927_s12   ;;  %s689_s11 = sphi %s725_s11, %s926_s11   ;;  %s685_s10 = sphi %s723_s10, %s925_s10   ;;  %s681_s9 = sphi %s721_s9, %s924_s9  }
   0x9   : > { %s34_s17 = sadd.s32 1, %s697_s13  ;;  %s43_s18 = sadd.s32 1, %s689_s11 }
   0xa   : > { %p36_p0 = scmp.ge.s32.totalorder %s34_s17, 2  ;;  %p50_p1 = scmp.ne.s32.totalorder %s689_s11, %s685_s10 }
   0xb   : > { %p51_p2 = scmp.eq.s32.totalorder %s701_s14, 0  ;;  %p56_p3 = scmp.ne.s32.totalorder %s685_s10, %s681_s9 }
   0xc   : > { %s930_s17 = smov (%p36_p0, %s34_s17), 0  ;;  %p57_p5 = scmp.eq.s32.totalorder %s475_s15, 0 }
   0xd   : > { %p762_p4 = por %p51_p2, %p50_p1  ;;  %s38_s20 = ssub.s32 %s697_s13, %s930_s17 }
   0xe   : > { %p80_p6 = scmp.eq.s32.totalorder %s475_s15, 1  ;;  %p41_p7 = scmp.eq.s32.totalorder %s38_s20, 0 }
   0xf   : > { %p768_p8 = por %p57_p5, %p56_p3  ;;  %p86_p10 = scmp.eq.s32.totalorder %s476_s16, 1 }
  0x10   : > { %p772_p9 = por %p80_p6, %p50_p1  ;;  %p478_p12 = scmp.ge.s32.totalorder %s701_s14, 2 }
  0x11   : > { %s777_s23 = scalar_select %p41_p7, %s689_s11, %s43_s18  }
  0x12   : > { %p779_p11 = por %p86_p10, %p56_p3  ;;  %p504_p13 = scmp.lt.s32.totalorder %s701_s14, 2 }
  0x13   : > { %s132_s25 = sand.u32 1, %s689_s11   ;;  %s486_s27 = sshll.u32 %s697_s13, 8 }
  0x14   : > { %s479_s26 = sshll.u32 %s132_s25, 8  ;;  %s143_s30 = scalar_lea.hbm %s917_s0, %s486_s27 }
  0x15   : > { %s136_s3 = scalar_lea.vmem [#allocation2], %s479_s26  ;;  %s144_s5 = sshll.u32 %s143_s30, 4  ;;  %s145_s5 = int_to_ptr.hbm [resolvable:$true] %s144_s5 }
  0x16   : > { %s146_s4 = sshll.u32 %s136_s3, 4  ;;  %p494_p0 = pnand %p504_p13, %p762_p4  ;;  %s147_s4 = int_to_ptr.vmem [resolvable:$true] %s146_s4 }
  0x17   : > { %p482_p1 = scmp.ge.s32.totalorder %s701_s14, 1  ;;  %s133_s6 = scalar_lea.sflag [#allocation3], %s132_s25 }
  0x18   : > { %s703_s7 = smov 128   ;;  %s704_s8 = smov 8  }
  0x19   : > { %496 = dma.hbm_to_vmem [thread:$0]  (!%p494_p0), %s145_s5, 4096, %s147_s4, %s133_s6, %s703_s7, %s703_s7, %s704_s8  }
  0x1a   : > { %p154_p2 = scmp.lt.s32.totalorder %s701_s14, 3 }
  0x1c   : > { %p155_p3 = pnand %p482_p1, %p154_p2 }
  0x1d   : > { %s795_s15 = sand.u32 (!%p155_p3), 1, %s685_s10  }
  0x1e   : > { %158 = sbr.rel (%p155_p3) target bundleno = 128 (0x80), region = 24  ;;  %s483_s16 = sshll.u32 (!%p155_p3), %s795_s15, 8 }
  0x1f   : > { %s161_s18 = scalar_lea.sflag (!%p155_p3), [#allocation3], %s795_s15  ;;  %s799_s20 = scalar_lea.vmem (!%p155_p3), [#allocation2], %s483_s16 }
  0x23   : > { %668 = dma.done.wait (%p768_p8), %s161_s18, 4096  }
  0x24   : > { %670 = vsyncadd (%p768_p8), %s161_s18, 4294963200  ;;  %s806_s19 = scalar_lea.vmem [#allocation5], %s795_s15  ;;  %v705_v0 = vmov 0.0   ;;  %s810_s25 = scalar_lea.vmem [#allocation6], %s795_s15  ;;  %v196_v1 = vld [vmem:[%s799_s20] sm:$0xff]  ;;  %v197_v2 = vld [vmem:[%s799_s20 + $0x8] sm:$0xff] }
  0x25   : > { %194 = vst [vmem:[%s806_s19] sm:$0x1] %v705_v0  ;;  %v198_v3 = vld [vmem:[%s799_s20 + $0x10] sm:$0xff]  ;;  %v199_v4 = vld [vmem:[%s799_s20 + $0x18] sm:$0xff]  ;;  %v229_v5 = vadd.f32 %v197_v2, %v196_v1  ;;  %v269_v6 = vmul.f32 %v196_v1, %v196_v1  ;;  %v270_v7 = vmul.f32 %v197_v2, %v197_v2  ;;  %v200_v9 = vld [vmem:[%s799_s20 + $0x20] sm:$0xff]  ;;  %s353_s27 = scalar_lea.hbm %s918_s1, %s693_s12  ;;  %s366_s30 = scalar_lea.hbm %s919_s2, %s693_s12 }
  0x26   : > { %195 = vst [vmem:[%s810_s25] sm:$0x1] %v705_v0  ;;  %v271_v8 = vmul.f32 %v198_v3, %v198_v3  ;;  %v272_v11 = vmul.f32 %v199_v4, %v199_v4  ;;  %v201_v13 = vld [vmem:[%s799_s20 + $0x28] sm:$0xff]  ;;  %v273_v15 = vmul.f32 %v200_v9, %v200_v9  ;;  %v202_v17 = vld [vmem:[%s799_s20 + $0x30] sm:$0xff]  ;;  %v203_v21 = vld [vmem:[%s799_s20 + $0x38] sm:$0xff]  ;;  %s355_s3 = sshll.u32 %s806_s19, 4  ;;  %s855_s4 = sshll.u32 %s353_s27, 4  ;;  %s356_s3 = int_to_ptr.vmem [resolvable:$true] %s355_s3  ;;  %s358_s4 = int_to_ptr.hbm [resolvable:$true] %s855_s4 }
  0x27   : > { %v230_v10 = vadd.f32 %v229_v5, %v198_v3  ;;  %v301_v12 = vadd.f32 %v270_v7, %v269_v6  ;;  %v274_v19 = vmul.f32 %v201_v13, %v201_v13  ;;  %v275_v23 = vmul.f32 %v202_v17, %v202_v17  ;;  %v204_v25 = vld [vmem:[%s799_s20 + $0x40] sm:$0xff]  ;;  %v205_v29 = vld [vmem:[%s799_s20 + $0x48] sm:$0xff]  ;;  %v206_v33 = vld [vmem:[%s799_s20 + $0x50] sm:$0xff]  ;;  %s368_s5 = sshll.u32 %s810_s25, 4  ;;  %s858_s6 = sshll.u32 %s366_s30, 4  ;;  %s863_s5 = int_to_ptr.vmem [resolvable:$true] %s368_s5  ;;  %s371_s6 = int_to_ptr.hbm [resolvable:$true] %s858_s6 }
  0x28   : > { %v276_v27 = vmul.f32 %v203_v21, %v203_v21  ;;  %v277_v31 = vmul.f32 %v204_v25, %v204_v25  ;;  %v278_v35 = vmul.f32 %v205_v29, %v205_v29  ;;  %v207_v37 = vld [vmem:[%s799_s20 + $0x58] sm:$0xff]  ;;  %v279_v39 = vmul.f32 %v206_v33, %v206_v33  ;;  %v208_v41 = vld [vmem:[%s799_s20 + $0x60] sm:$0xff]  ;;  %v209_v45 = vld [vmem:[%s799_s20 + $0x68] sm:$0xff]  ;;  %s341_s12 = scalar_lea.sflag [#allocation4], %s795_s15  ;;  %s601_s7 = sshra.s32 %s358_s4, 4  ;;  %s602_s7 = int_to_ptr.hbm [resolvable:$true] %s601_s7 }
  0x29   : > { %v231_v14 = vadd.f32 %v230_v10, %v199_v4  ;;  %v302_v16 = vadd.f32 %v301_v12, %v271_v8  ;;  %v280_v43 = vmul.f32 %v207_v37, %v207_v37  ;;  %v281_v47 = vmul.f32 %v208_v41, %v208_v41  ;;  %v210_v49 = vld [vmem:[%s799_s20 + $0x70] sm:$0xff]  ;;  %v211_v53 = vld [vmem:[%s799_s20 + $0x78] sm:$0xff]  ;;  %v212_v57 = vld [vmem:[%s799_s20 + $0x80] sm:$0xff]  ;;  %s603_s8 = scalar_lea.hbm %s602_s7, 1  ;;  %p608_p7 = scmp.lt.s32.totalorder %s602_s7, %s918_s1 }
  0x2a   : > { %v282_v51 = vmul.f32 %v209_v45, %v209_v45  ;;  %v283_v55 = vmul.f32 %v210_v49, %v210_v49  ;;  %v284_v59 = vmul.f32 %v211_v53, %v211_v53  ;;  %v213_v61 = vld [vmem:[%s799_s20 + $0x88] sm:$0xff]  ;;  %v285_v63 = vmul.f32 %v212_v57, %v212_v57  ;;  %v214_v1 = vld [vmem:[%s799_s20 + $0x90] sm:$0xff]  ;;  %v215_v5 = vld [vmem:[%s799_s20 + $0x98] sm:$0xff]  ;;  %p604_p4 = scmp.ne.s32.totalorder %s602_s7, %s603_s8 }
  0x2b   : > { %v232_v18 = vadd.f32 %v231_v14, %v200_v9  ;;  %v303_v20 = vadd.f32 %v302_v16, %v272_v11  ;;  %v286_v3 = vmul.f32 %v213_v61, %v213_v61  ;;  %v287_v7 = vmul.f32 %v214_v1, %v214_v1  ;;  %v216_v9 = vld [vmem:[%s799_s20 + $0xa0] sm:$0xff] }
  0x2c   : > { %v288_v11 = vmul.f32 %v215_v5, %v215_v5  ;;  %p605_p5 = pnand %p604_p4, %p772_p9 }
  0x2d   : > { %v233_v22 = vadd.f32 %v232_v18, %v201_v13  ;;  %v304_v24 = vadd.f32 %v303_v20, %v273_v15  ;;  %v217_v13 = vld [vmem:[%s799_s20 + $0xa8] sm:$0xff]  ;;  %v289_v15 = vmul.f32 %v216_v9, %v216_v9 }
  0x2e   : > { %p606_p6 = pneg %p605_p5 }
  0x2f   : > { %v234_v26 = vadd.f32 %v233_v22, %v202_v17  ;;  %v305_v28 = vadd.f32 %v304_v24, %v274_v19  ;;  %v218_v17 = vld [vmem:[%s799_s20 + $0xb0] sm:$0xff]  ;;  %v290_v19 = vmul.f32 %v217_v13, %v217_v13 }
  0x31   : > { %v235_v30 = vadd.f32 %v234_v26, %v203_v21  ;;  %v306_v32 = vadd.f32 %v305_v28, %v275_v23  ;;  %v219_v21 = vld [vmem:[%s799_s20 + $0xb8] sm:$0xff]  ;;  %v291_v23 = vmul.f32 %v218_v17, %v218_v17 }
  0x33   : > { %v236_v34 = vadd.f32 %v235_v30, %v204_v25  ;;  %v307_v36 = vadd.f32 %v306_v32, %v276_v27  ;;  %v220_v25 = vld [vmem:[%s799_s20 + $0xc0] sm:$0xff]  ;;  %v292_v27 = vmul.f32 %v219_v21, %v219_v21 }
  0x35   : > { %v237_v38 = vadd.f32 %v236_v34, %v205_v29  ;;  %v308_v40 = vadd.f32 %v307_v36, %v277_v31  ;;  %v221_v29 = vld [vmem:[%s799_s20 + $0xc8] sm:$0xff]  ;;  %v293_v31 = vmul.f32 %v220_v25, %v220_v25 }
  0x37   : > { %v238_v42 = vadd.f32 %v237_v38, %v206_v33  ;;  %v309_v44 = vadd.f32 %v308_v40, %v278_v35  ;;  %v222_v33 = vld [vmem:[%s799_s20 + $0xd0] sm:$0xff]  ;;  %v294_v35 = vmul.f32 %v221_v29, %v221_v29 }
  0x39   : > { %v239_v46 = vadd.f32 %v238_v42, %v207_v37  ;;  %v310_v48 = vadd.f32 %v309_v44, %v279_v39  ;;  %v223_v37 = vld [vmem:[%s799_s20 + $0xd8] sm:$0xff]  ;;  %v295_v39 = vmul.f32 %v222_v33, %v222_v33 }
  0x3b   : > { %v240_v50 = vadd.f32 %v239_v46, %v208_v41  ;;  %v311_v52 = vadd.f32 %v310_v48, %v280_v43  ;;  %v224_v41 = vld [vmem:[%s799_s20 + $0xe0] sm:$0xff]  ;;  %v296_v43 = vmul.f32 %v223_v37, %v223_v37 }
  0x3d   : > { %v241_v54 = vadd.f32 %v240_v50, %v209_v45  ;;  %v312_v56 = vadd.f32 %v311_v52, %v281_v47  ;;  %v225_v45 = vld [vmem:[%s799_s20 + $0xe8] sm:$0xff]  ;;  %v297_v47 = vmul.f32 %v224_v41, %v224_v41 }
  0x3f   : > { %v242_v58 = vadd.f32 %v241_v54, %v210_v49  ;;  %v313_v60 = vadd.f32 %v312_v56, %v282_v51  ;;  %v226_v49 = vld [vmem:[%s799_s20 + $0xf0] sm:$0xff]  ;;  %v298_v51 = vmul.f32 %v225_v45, %v225_v45 }
  0x41   : > { %v243_v62 = vadd.f32 %v242_v58, %v211_v53  ;;  %v314_v0 = vadd.f32 %v313_v60, %v283_v55  ;;  %v227_v53 = vld [vmem:[%s799_s20 + $0xf8] sm:$0xff]  ;;  %v299_v55 = vmul.f32 %v226_v49, %v226_v49  ;;  %s607_s20 = scalar_lea.hbm %s918_s1, 2 }
  0x42   : > { %v300_v58 = vmul.f32 %v227_v53, %v227_v53  ;;  %p609_p8 = scmp.lt.s32.totalorder %s607_s20, %s603_s8 }
  0x43   : > { %v244_v2 = vadd.f32 %v243_v62, %v212_v57  ;;  %v315_v4 = vadd.f32 %v314_v0, %v284_v59 }
  0x44   : > { %p610_p10 = por %p609_p8, %p608_p7 }
  0x45   : > { %v245_v6 = vadd.f32 %v244_v2, %v213_v61  ;;  %v316_v8 = vadd.f32 %v315_v4, %v285_v63 }
  0x46   : > { %p611_p13 = pnand %p610_p10, %p606_p6 }
  0x47   : > { %v246_v10 = vadd.f32 %v245_v6, %v214_v1  ;;  %v317_v12 = vadd.f32 %v316_v8, %v286_v3 }
  0x49   : > { %v247_v14 = vadd.f32 %v246_v10, %v215_v5  ;;  %v318_v16 = vadd.f32 %v317_v12, %v287_v7  ;;  %v228_v7 = vld [vmem:[%s806_s19] sm:$0x1] }
  0x4a   : > { %v268_v12 = vld [vmem:[%s810_s25] sm:$0x1] }
  0x4b   : > { %v248_v18 = vadd.f32 %v247_v14, %v216_v9  ;;  %v319_v20 = vadd.f32 %v318_v16, %v288_v11 }
  0x4d   : > { %v249_v22 = vadd.f32 %v248_v18, %v217_v13  ;;  %v320_v24 = vadd.f32 %v319_v20, %v289_v15 }
  0x4f   : > { %v250_v26 = vadd.f32 %v249_v22, %v218_v17  ;;  %v321_v28 = vadd.f32 %v320_v24, %v290_v19 }
  0x51   : > { %v251_v30 = vadd.f32 %v250_v26, %v219_v21  ;;  %v322_v32 = vadd.f32 %v321_v28, %v291_v23 }
  0x53   : > { %v252_v34 = vadd.f32 %v251_v30, %v220_v25  ;;  %v323_v36 = vadd.f32 %v322_v32, %v292_v27 }
  0x55   : > { %v253_v38 = vadd.f32 %v252_v34, %v221_v29  ;;  %v324_v40 = vadd.f32 %v323_v36, %v293_v31 }
  0x57   : > { %v254_v42 = vadd.f32 %v253_v38, %v222_v33  ;;  %v325_v44 = vadd.f32 %v324_v40, %v294_v35 }
  0x59   : > { %v255_v46 = vadd.f32 %v254_v42, %v223_v37  ;;  %v326_v48 = vadd.f32 %v325_v44, %v295_v39 }
  0x5b   : > { %v256_v50 = vadd.f32 %v255_v46, %v224_v41  ;;  %v327_v52 = vadd.f32 %v326_v48, %v296_v43 }
  0x5d   : > { %v257_v54 = vadd.f32 %v256_v50, %v225_v45  ;;  %v328_v56 = vadd.f32 %v327_v52, %v297_v47 }
  0x5f   : > { %v258_v57 = vadd.f32 %v257_v54, %v226_v49  ;;  %v329_v59 = vadd.f32 %v328_v56, %v298_v51 }
  0x61   : > { %v259_v60 = vadd.f32 %v258_v57, %v227_v53  ;;  %v330_v61 = vadd.f32 %v329_v59, %v299_v55 }
  0x63   : > { %v260_v62 = vrot.slane %v259_v60, 4  ;;  %v331_v63 = vadd.f32 %v330_v61, %v300_v58 }
  0x65   : > { %v261_v0 = vadd.f32 %v260_v62, %v259_v60  ;;  %v332_v1 = vrot.slane %v331_v63, 4 }
  0x67   : > { %v262_v2 = vrot.slane %v261_v0, 2  ;;  %v333_v3 = vadd.f32 %v332_v1, %v331_v63 }
  0x69   : > { %v263_v4 = vadd.f32 %v262_v2, %v261_v0  ;;  %v334_v5 = vrot.slane %v333_v3, 2 }
  0x6b   : > { %v264_v6 = vrot.slane %v263_v4, 1  ;;  %v335_v8 = vadd.f32 %v334_v5, %v333_v3 }
  0x6d   : > { %v265_v9 = vadd.f32 %v264_v6, %v263_v4  ;;  %v336_v10 = vrot.slane %v335_v8, 1 }
  0x6f   : > { %v266_v11 = vadd.f32 %v265_v9, %v228_v7  ;;  %v337_v13 = vadd.f32 %v336_v10, %v335_v8 }
  0x71   : > { %267 = vst [vmem:[%s806_s19] sm:$0x1] %v266_v11  ;;  %v338_v14 = vadd.f32 %v337_v13, %v268_v12 }
  0x72   : > { %614 = shalt.err (!%p611_p13)
}
  0x73   : > { %489 = dma.vmem_to_hbm [thread:$0]  (%p772_p9), %s356_s3, 16, %s358_s4, %s341_s12   ;;  %339 = vst [vmem:[%s810_s25] sm:$0x1] %v338_v14 }
  0x74   : > { %s345_s19 = scalar_lea.sflag [#allocation7], %s795_s15  ;;  %s629_s27 = sshra.s32 %s371_s6, 4  ;;  %s630_s27 = int_to_ptr.hbm [resolvable:$true] %s629_s27 }
  0x75   : > { %s631_s28 = scalar_lea.hbm %s630_s27, 1  ;;  %s635_s7 = scalar_lea.hbm %s919_s2, 2 }
  0x76   : > { %p632_p0 = scmp.ne.s32.totalorder %s630_s27, %s631_s28  ;;  %p636_p3 = scmp.lt.s32.totalorder %s630_s27, %s919_s2 }
  0x77   : > { %p637_p4 = scmp.lt.s32.totalorder %s635_s7, %s631_s28 }
  0x78   : > { %p633_p1 = pnand %p632_p0, %p772_p9 }
  0x79   : > { %p638_p5 = por %p637_p4, %p636_p3 }
  0x7a   : > { %p634_p2 = pneg %p633_p1 }
  0x7c   : > { %p639_p6 = pnand %p638_p5, %p634_p2 }
  0x7e   : > { %642 = shalt.err (!%p639_p6)
}
  0x7f   : > { %490 = dma.vmem_to_hbm [thread:$0]  (%p772_p9), %s863_s5, 16, %s371_s6, %s345_s19  }
  0x80 PF: > { %s382_s15 = sand.u32 1, %s681_s9   ;;  %p498_p7 = pnand %p478_p12, %p779_p11 }
  0x81   : > { %s383_s25 = scalar_lea.sflag [#allocation4], %s382_s15 }
  0x82   : > { %p499_p8 = pneg %p498_p7 }
  0x84   : > { %672 = dma.done.wait (%p499_p8), %s383_s25, 16  }
  0x85   : > { %674 = vsyncadd (%p499_p8), %s383_s25, 4294967280  ;;  %s392_s3 = scalar_lea.sflag [#allocation7], %s382_s15 }
  0x86   : > { %676 = dma.done.wait (%p499_p8), %s392_s3, 16  }
  0x87   : > { %678 = vsyncadd (%p499_p8), %s392_s3, 4294967280  ;;  %s22_s14 = sadd.s32 1, %s701_s14   ;;  %s924_s9 = smov %s685_s10 }
  0x88   : > { %p19_p10 = scmp.ge.s32.totalorder %s22_s14, 4   ;;  %s925_s10 = smov %s689_s11 }
  0x89   : > { %s926_s11 = smov %s777_s23  ;;  %s927_s12 = smov %s697_s13 }
  0x8a   : > { %s928_s13 = smov %s930_s17  ;;  %21 = sbr.rel (!%p19_p10) target bundleno = 8 (0x8), region = 90 }
  0x8f   :  { %397 = vsyncpa [#allocation3], 1 }
  0x90   :  { %399 = vsyncpa [#allocation3 + $0x1], 1 }
  0x91   :  { %400 = vsyncpa [#allocation4], 1 }
  0x92   :  { %402 = vsyncpa [#allocation4 + $0x1], 1 }
  0x93   :  { %403 = vsyncpa [#allocation7], 1 }
  0x94   :  { %405 = vsyncpa [#allocation7 + $0x1], 1 }

</bundles_post_ra>
